<compile_context>
chip_gen: v5e
topology: v5e:2x2
jax: 0.10.0
libtpu: 0.0.40
codegen_flags: <defaults>
</compile_context>

<pallas_src>
import jax
import jax.numpy as jnp
from jax.experimental import pallas as pl
from jax.experimental.pallas import tpu as pltpu


_NEG = -1.0e30  # padded-logit bias: exp(pad - max) == 0, keeps softmax exact


def mlp_kernel(x_ref, w1_ref, b1_ref, w2_ref, b2_ref,
               w3_ref, b3_ref, w4_ref, b4_ref, o_ref):
    cd = w1_ref.dtype  # MXU operand dtype (f32 default, bf16 optional)
    # fc1 + relu   (x tile is (TB, 784), w1 is (784, 128)) -- f32 accumulation
    h = jnp.dot(x_ref[...], w1_ref[...], preferred_element_type=jnp.float32)
    h = jnp.maximum(h + b1_ref[...], 0.0)
    # fc2 + relu
    h = jnp.dot(h.astype(cd), w2_ref[...], preferred_element_type=jnp.float32)
    h = jnp.maximum(h + b2_ref[...], 0.0)
    # fc3 + relu
    h = jnp.dot(h.astype(cd), w3_ref[...], preferred_element_type=jnp.float32)
    h = jnp.maximum(h + b3_ref[...], 0.0)
    # fc4 (output padded to 128 lanes; padded columns carry a -1e30 f32 bias)
    logits = jnp.dot(h.astype(cd), w4_ref[...],
                     preferred_element_type=jnp.float32) + b4_ref[...]
    # log_softmax over dim=1, in f32.  Padded columns are ~-1e30 so they do not
    # affect the max and contribute exp()==0 to the denominator.
    m = jnp.max(logits, axis=1, keepdims=True)
    z = logits - m
    lse = jnp.log(jnp.sum(jnp.exp(z), axis=1, keepdims=True))
    o_ref[...] = z - lse


def _round_up(n, m):
    return ((n + m - 1) // m) * m


def net_forward(x, params, *, tb=512, compute_dtype=jnp.float32):
    """x: (B, 784) f32; params: dict of weights (in,out) f32 and biases (1,out) f32.

    compute_dtype=jnp.bfloat16 feeds the MXU bf16 operands (f32 accumulation,
    f32 bias / softmax) — faster on v6e/v7x but looser than 1e-4 vs. f32 ref.
    """
    B, F = x.shape
    Np = 128  # lane-dense logits width (>= 10); avoids masked partial stores

    # --- Batch tiling: near-full last tile, and >=2 tiles for v7x megacore ---
    Bp8 = _round_up(B, 8)
    n_tiles = max(1, -(-Bp8 // tb))
    if n_tiles == 1 and Bp8 >= 16:
        n_tiles = 2                      # let the v7x 'parallel' axis use both TCs
    TB = _round_up(-(-Bp8 // n_tiles), 8)
    Bp = TB * n_tiles                    # <= B + ~8*n_tiles dead rows

    # Only pad the batch when needed (no feature padding: x streams unmodified).
    xp = x if Bp == B else jnp.zeros((Bp, F), x.dtype).at[:B].set(x)

    cd = compute_dtype
    xp = xp.astype(cd)
    w1 = params["w1"].astype(cd)                                     # (784, 128)
    w2 = params["w2"].astype(cd)                                     # (128, 64)
    w3 = params["w3"].astype(cd)                                     # (64, 32)
    w4 = jnp.zeros((32, Np), cd).at[:, :10].set(params["w4"].astype(cd))
    b1, b2, b3 = params["b1"], params["b2"], params["b3"]            # f32 biases
    b4 = jnp.full((1, Np), _NEG, jnp.float32).at[:, :10].set(params["b4"])

    def resident(a):
        # Constant block index for every batch tile -> stays VMEM-resident
        # (DMA'd once, never re-fetched).
        return pl.BlockSpec(a.shape, lambda i: (0, 0))

    out = pl.pallas_call(
        mlp_kernel,
        out_shape=jax.ShapeDtypeStruct((Bp, Np), jnp.float32),
        grid=(Bp // TB,),
        in_specs=[
            pl.BlockSpec((TB, F), lambda i: (i, 0)),   # x: streamed over batch, unpadded K
            resident(w1), resident(b1),
            resident(w2), resident(b2),
            resident(w3), resident(b3),
            resident(w4), resident(b4),
        ],
        out_specs=pl.BlockSpec((TB, Np), lambda i: (i, 0)),
        compiler_params=pltpu.CompilerParams(
            dimension_semantics=("parallel",),   # v7x: shard batch tiles across 2 TCs
            vmem_limit_bytes=32 << 20,           # ~6 MiB actual at TB=512; headroom to TB~2048
        ),
    )(xp, w1, b1, w2, b2, w3, b3, w4, b4)

    # TODO(synk): for a fused downstream consumer (argmax / NLL) return the
    # padded (Bp, 128) buffer instead of slicing, to drop this extra HBM pass.
    return out[:B, :10]


def init_params(key):
    dims = [(28 * 28, 128), (128, 64), (64, 32), (32, 10)]
    params = {}
    keys = jax.random.split(key, len(dims) * 2)
    for i, (din, dout) in enumerate(dims):
        bound = 1.0 / jnp.sqrt(din)  # PyTorch nn.Linear default init range
        w = jax.random.uniform(keys[2 * i], (din, dout), jnp.float32, -bound, bound)
        b = jax.random.uniform(keys[2 * i + 1], (1, dout), jnp.float32, -bound, bound)
        params[f"w{i + 1}"] = w
        params[f"b{i + 1}"] = b
    return params


def net_forward_ref(x, p):
    h = jnp.maximum(x @ p["w1"] + p["b1"], 0.0)
    h = jnp.maximum(h @ p["w2"] + p["b2"], 0.0)
    h = jnp.maximum(h @ p["w3"] + p["b3"], 0.0)
    logits = h @ p["w4"] + p["b4"]
    return jax.nn.log_softmax(logits, axis=1)


if __name__ == "__main__":
    key = jax.random.PRNGKey(0)
    pkey, xkey = jax.random.split(key)
    params = init_params(pkey)
    x = jax.random.normal(xkey, (8, 28 * 28), jnp.float32)  # small batch = 8

    out = net_forward(x, params)
    out = jax.block_until_ready(out)

    ref = net_forward_ref(x, params)
    assert out.shape == (8, 10)
    assert jnp.allclose(out, ref, atol=1e-4, rtol=1e-4)
    print("KERNEL_OK")
</pallas_src>

<mosaic_0001>
module attributes {stable_mosaic.version = 11 : i64} {
  func.func @mlp_kernel(%arg0: i32, %arg1: memref<8x784xf32, #tpu.memory_space<vmem>>, %arg2: memref<784x128xf32, #tpu.memory_space<vmem>>, %arg3: memref<1x128xf32, #tpu.memory_space<vmem>>, %arg4: memref<128x64xf32, #tpu.memory_space<vmem>>, %arg5: memref<1x64xf32, #tpu.memory_space<vmem>>, %arg6: memref<64x32xf32, #tpu.memory_space<vmem>>, %arg7: memref<1x32xf32, #tpu.memory_space<vmem>>, %arg8: memref<32x128xf32, #tpu.memory_space<vmem>>, %arg9: memref<1x128xf32, #tpu.memory_space<vmem>>, %arg10: memref<8x128xf32, #tpu.memory_space<vmem>>) attributes {dimension_semantics = [#tpu.dimension_semantics<parallel>], iteration_bounds = array<i64: 1>, scalar_prefetch = 0 : i64, scratch_operands = 0 : i64, tpu.core_type = #tpu.core_type<tc>, window_params = [{transform_indices = @transform_0, window_bounds = array<i64: 8, 784>}, {pipeline_mode = #tpu.pipeline_mode<synchronous>, transform_indices = @transform_1, window_bounds = array<i64: 784, 128>}, {pipeline_mode = #tpu.pipeline_mode<synchronous>, transform_indices = @transform_2, window_bounds = array<i64: 1, 128>}, {pipeline_mode = #tpu.pipeline_mode<synchronous>, transform_indices = @transform_3, window_bounds = array<i64: 128, 64>}, {pipeline_mode = #tpu.pipeline_mode<synchronous>, transform_indices = @transform_4, window_bounds = array<i64: 1, 64>}, {pipeline_mode = #tpu.pipeline_mode<synchronous>, transform_indices = @transform_5, window_bounds = array<i64: 64, 32>}, {pipeline_mode = #tpu.pipeline_mode<synchronous>, transform_indices = @transform_6, window_bounds = array<i64: 1, 32>}, {pipeline_mode = #tpu.pipeline_mode<synchronous>, transform_indices = @transform_7, window_bounds = array<i64: 32, 128>}, {pipeline_mode = #tpu.pipeline_mode<synchronous>, transform_indices = @transform_8, window_bounds = array<i64: 1, 128>}, {transform_indices = @transform_9, window_bounds = array<i64: 8, 128>}]} {
    %c0 = arith.constant 0 : index
    %c0_0 = arith.constant 0 : index
    %0 = vector.load %arg1[%c0, %c0_0] : memref<8x784xf32, #tpu.memory_space<vmem>>, vector<8x784xf32>
    %c0_1 = arith.constant 0 : index
    %c0_2 = arith.constant 0 : index
    %1 = vector.load %arg2[%c0_1, %c0_2] : memref<784x128xf32, #tpu.memory_space<vmem>>, vector<784x128xf32>
    %cst = arith.constant dense<0.000000e+00> : vector<8x128xf32>
    %2 = tpu.matmul %0, %1, %cst {dimension_numbers = #tpu.dot_dimension_numbers<[1], [0], [0], [1], [0, 0, 1, 1], [], []>} : vector<8x784xf32>, vector<784x128xf32>, vector<8x128xf32> -> vector<8x128xf32>
    %c0_3 = arith.constant 0 : index
    %c0_4 = arith.constant 0 : index
    %3 = vector.load %arg3[%c0_3, %c0_4] : memref<1x128xf32, #tpu.memory_space<vmem>>, vector<1x128xf32>
    %4 = vector.broadcast %3 : vector<1x128xf32> to vector<8x128xf32>
    %5 = arith.addf %2, %4 : vector<8x128xf32>
    %cst_5 = arith.constant 0.000000e+00 : f32
    %6 = vector.broadcast %cst_5 : f32 to vector<8x128xf32>
    %7 = arith.maximumf %5, %6 : vector<8x128xf32>
    %c0_6 = arith.constant 0 : index
    %c0_7 = arith.constant 0 : index
    %8 = vector.load %arg4[%c0_6, %c0_7] : memref<128x64xf32, #tpu.memory_space<vmem>>, vector<128x64xf32>
    %cst_8 = arith.constant dense<0.000000e+00> : vector<8x64xf32>
    %9 = tpu.matmul %7, %8, %cst_8 {dimension_numbers = #tpu.dot_dimension_numbers<[1], [0], [0], [1], [0, 0, 1, 1], [], []>} : vector<8x128xf32>, vector<128x64xf32>, vector<8x64xf32> -> vector<8x64xf32>
    %c0_9 = arith.constant 0 : index
    %c0_10 = arith.constant 0 : index
    %10 = vector.load %arg5[%c0_9, %c0_10] : memref<1x64xf32, #tpu.memory_space<vmem>>, vector<1x64xf32>
    %11 = vector.broadcast %10 : vector<1x64xf32> to vector<8x64xf32>
    %12 = arith.addf %9, %11 : vector<8x64xf32>
    %cst_11 = arith.constant 0.000000e+00 : f32
    %13 = vector.broadcast %cst_11 : f32 to vector<8x64xf32>
    %14 = arith.maximumf %12, %13 : vector<8x64xf32>
    %c0_12 = arith.constant 0 : index
    %c0_13 = arith.constant 0 : index
    %15 = vector.load %arg6[%c0_12, %c0_13] : memref<64x32xf32, #tpu.memory_space<vmem>>, vector<64x32xf32>
    %cst_14 = arith.constant dense<0.000000e+00> : vector<8x32xf32>
    %16 = tpu.matmul %14, %15, %cst_14 {dimension_numbers = #tpu.dot_dimension_numbers<[1], [0], [0], [1], [0, 0, 1, 1], [], []>} : vector<8x64xf32>, vector<64x32xf32>, vector<8x32xf32> -> vector<8x32xf32>
    %c0_15 = arith.constant 0 : index
    %c0_16 = arith.constant 0 : index
    %17 = vector.load %arg7[%c0_15, %c0_16] : memref<1x32xf32, #tpu.memory_space<vmem>>, vector<1x32xf32>
    %18 = vector.broadcast %17 : vector<1x32xf32> to vector<8x32xf32>
    %19 = arith.addf %16, %18 : vector<8x32xf32>
    %cst_17 = arith.constant 0.000000e+00 : f32
    %20 = vector.broadcast %cst_17 : f32 to vector<8x32xf32>
    %21 = arith.maximumf %19, %20 : vector<8x32xf32>
    %c0_18 = arith.constant 0 : index
    %c0_19 = arith.constant 0 : index
    %22 = vector.load %arg8[%c0_18, %c0_19] : memref<32x128xf32, #tpu.memory_space<vmem>>, vector<32x128xf32>
    %cst_20 = arith.constant dense<0.000000e+00> : vector<8x128xf32>
    %23 = tpu.matmul %21, %22, %cst_20 {dimension_numbers = #tpu.dot_dimension_numbers<[1], [0], [0], [1], [0, 0, 1, 1], [], []>} : vector<8x32xf32>, vector<32x128xf32>, vector<8x128xf32> -> vector<8x128xf32>
    %c0_21 = arith.constant 0 : index
    %c0_22 = arith.constant 0 : index
    %24 = vector.load %arg9[%c0_21, %c0_22] : memref<1x128xf32, #tpu.memory_space<vmem>>, vector<1x128xf32>
    %25 = vector.broadcast %24 : vector<1x128xf32> to vector<8x128xf32>
    %26 = arith.addf %23, %25 : vector<8x128xf32>
    %cst_23 = arith.constant dense<0xFF800000> : vector<8xf32>
    %27 = vector.multi_reduction <maximumf>, %26, %cst_23 [1] : vector<8x128xf32> to vector<8xf32>
    %28 = vector.shape_cast %27 : vector<8xf32> to vector<8x1xf32>
    %29 = vector.broadcast %28 : vector<8x1xf32> to vector<8x128xf32>
    %30 = arith.subf %26, %29 : vector<8x128xf32>
    %31 = math.exp %30 : vector<8x128xf32>
    %cst_24 = arith.constant dense<0.000000e+00> : vector<8xf32>
    %32 = vector.multi_reduction <add>, %31, %cst_24 [1] : vector<8x128xf32> to vector<8xf32>
    %33 = vector.shape_cast %32 : vector<8xf32> to vector<8x1xf32>
    %34 = math.log %33 : vector<8x1xf32>
    %35 = vector.broadcast %34 : vector<8x1xf32> to vector<8x128xf32>
    %36 = arith.subf %30, %35 : vector<8x128xf32>
    %c0_25 = arith.constant 0 : index
    %c0_26 = arith.constant 0 : index
    %37 = vector.load %arg10[%c0_25, %c0_26] : memref<8x128xf32, #tpu.memory_space<vmem>>, vector<8x128xf32>
    tpu.vector_store %arg10[%c0_25, %c0_26], %36 {strides = array<i32>} : memref<8x128xf32, #tpu.memory_space<vmem>>, vector<8x128xf32>,
    return
  }
  func.func @transform_0(%arg0: i32) -> (i32, i32) {
    %c0_i32 = arith.constant 0 : i32
    %c0_i32_0 = arith.constant 0 : i32
    return %arg0, %c0_i32 : i32, i32
  }
  func.func @transform_1(%arg0: i32) -> (i32, i32) {
    %c0_i32 = arith.constant 0 : i32
    %c0_i32_0 = arith.constant 0 : i32
    %c0_i32_1 = arith.constant 0 : i32
    return %c0_i32, %c0_i32_0 : i32, i32
  }
  func.func @transform_2(%arg0: i32) -> (i32, i32) {
    %c0_i32 = arith.constant 0 : i32
    %c0_i32_0 = arith.constant 0 : i32
    %c0_i32_1 = arith.constant 0 : i32
    return %c0_i32, %c0_i32_0 : i32, i32
  }
  func.func @transform_3(%arg0: i32) -> (i32, i32) {
    %c0_i32 = arith.constant 0 : i32
    %c0_i32_0 = arith.constant 0 : i32
    %c0_i32_1 = arith.constant 0 : i32
    return %c0_i32, %c0_i32_0 : i32, i32
  }
  func.func @transform_4(%arg0: i32) -> (i32, i32) {
    %c0_i32 = arith.constant 0 : i32
    %c0_i32_0 = arith.constant 0 : i32
    %c0_i32_1 = arith.constant 0 : i32
    return %c0_i32, %c0_i32_0 : i32, i32
  }
  func.func @transform_5(%arg0: i32) -> (i32, i32) {
    %c0_i32 = arith.constant 0 : i32
    %c0_i32_0 = arith.constant 0 : i32
    %c0_i32_1 = arith.constant 0 : i32
    return %c0_i32, %c0_i32_0 : i32, i32
  }
  func.func @transform_6(%arg0: i32) -> (i32, i32) {
    %c0_i32 = arith.constant 0 : i32
    %c0_i32_0 = arith.constant 0 : i32
    %c0_i32_1 = arith.constant 0 : i32
    return %c0_i32, %c0_i32_0 : i32, i32
  }
  func.func @transform_7(%arg0: i32) -> (i32, i32) {
    %c0_i32 = arith.constant 0 : i32
    %c0_i32_0 = arith.constant 0 : i32
    %c0_i32_1 = arith.constant 0 : i32
    return %c0_i32, %c0_i32_0 : i32, i32
  }
  func.func @transform_8(%arg0: i32) -> (i32, i32) {
    %c0_i32 = arith.constant 0 : i32
    %c0_i32_0 = arith.constant 0 : i32
    %c0_i32_1 = arith.constant 0 : i32
    return %c0_i32, %c0_i32_0 : i32, i32
  }
  func.func @transform_9(%arg0: i32) -> (i32, i32) {
    %c0_i32 = arith.constant 0 : i32
    %c0_i32_0 = arith.constant 0 : i32
    return %arg0, %c0_i32 : i32, i32
  }
}

</mosaic_0001>

<bundles_post_ra>
// kernel: tpu_custom_call.1
= control target key start
LH: loop header
LB: loop body
LE: loop exit
PB: predicated region body
PF: predicated region fallthrough
CT: control target
= control target key end

     0   :  { %14 = vsyncpa [#allocation3], 0  ;;  %s685_s0 = inlined_call_operand.vmem [shape: f32[8,784], index: 0, kind: input, shape index: {}]   ;;  %s686_s1 = inlined_call_operand.hbm [shape: f32[784,128], index: 1, kind: input, shape index: {}]   ;;  %s687_s2 = inlined_call_operand.vmem [shape: f32[1,128], index: 2, kind: input, shape index: {}]   ;;  %s688_s3 = inlined_call_operand.vmem [shape: f32[128,64], index: 3, kind: input, shape index: {}]   ;;  %s689_s4 = inlined_call_operand.vmem [shape: f32[1,64], index: 4, kind: input, shape index: {}]   ;;  %s690_s5 = inlined_call_operand.vmem [shape: f32[64,32], index: 5, kind: input, shape index: {}]   ;;  %s691_s6 = inlined_call_operand.vmem [shape: f32[1,32], index: 6, kind: input, shape index: {}]   ;;  %s692_s7 = inlined_call_operand.vmem [shape: f32[32,128], index: 7, kind: input, shape index: {}]   ;;  %s693_s8 = inlined_call_operand.vmem [shape: f32[1,128], index: 8, kind: input, shape index: {}]   ;;  %s694_s9 = inlined_call_operand.hbm [shape: f32[8,128], index: 9, kind: output, shape index: {}]  }
   0x1   :  { %15 = vsyncpa [#allocation4], 0  ;;  %s22_s11 = sshll.u32 %s686_s1, 4  ;;  %s508_s12 = smov [#allocation2]   ;;  %s23_s11 = int_to_ptr.hbm [resolvable:$true] %s22_s11 }
   0x2   :  { %s24_s13 = sshll.u32 %s508_s12, 4  ;;  %s509_s14 = smov 128   ;;  %s25_s13 = int_to_ptr.vmem [resolvable:$true] %s24_s13 }
   0x3   :  { %s510_s15 = smov 8  }
   0x4   :  { %30 = dma.hbm_to_vmem [thread:$0]  %s23_s11, 12544, %s25_s13, [#allocation3], %s509_s14, %s509_s14, %s510_s15  }
   0x5   :  { %504 = dma.done.wait [#allocation3], 12544  }
   0x6   :  { %505 = vsyncadd [#allocation3], 4294954752  ;;  %v71_v0 = vld [vmem:[#allocation2 + $0x78] sm:$0xff]  ;;  %v70_v1 = vld [vmem:[#allocation2 + $0x70] sm:$0xff]  ;;  %vm158_vm0 = vcmask 130048   ;;  %vm356_vm1 = vcmask 523264  }
   0x7   :  { %v87_v2 = vld [vmem:[#allocation2 + $0xf8] sm:$0xff]  ;;  %162 = vmatpush.msra.mxu0 %v71_v0  ;;  %v86_v3 = vld [vmem:[#allocation2 + $0xf0] sm:$0xff]  ;;  %v69_v4 = vld [vmem:[#allocation2 + $0x68] sm:$0xff]  ;;  %vm389_vm2 = vcmask 261120   ;;  %s431_s23 = sshll.u32 %s694_s9, 4  ;;  %s432_s23 = int_to_ptr.hbm [resolvable:$true] %s431_s23 }
   0x8   :  { %182 = vmatpush.msra.mxu1 %v87_v2  ;;  %v85_v5 = vld [vmem:[#allocation2 + $0xe8] sm:$0xff]  ;;  %v68_v6 = vld [vmem:[#allocation2 + $0x60] sm:$0xff]  ;;  %v67_v8 = vld [vmem:[#allocation2 + $0x58] sm:$0xff] }
   0x9   :  { %163 = vmatpush.msra.mxu0 %v70_v1  ;;  %v84_v7 = vld [vmem:[#allocation2 + $0xe0] sm:$0xff]  ;;  %v83_v9 = vld [vmem:[#allocation2 + $0xd8] sm:$0xff]  ;;  %v66_v10 = vld [vmem:[#allocation2 + $0x50] sm:$0xff] }
   0xa   :  { %183 = vmatpush.msra.mxu1 %v86_v3  ;;  %v103_v11 = vld [vmem:[#allocation2 + $0x178] sm:$0xff]  ;;  %v82_v12 = vld [vmem:[#allocation2 + $0xd0] sm:$0xff]  ;;  %v101_v15 = vld [vmem:[#allocation2 + $0x168] sm:$0xff] }
   0xb   :  { %164 = vmatpush.msra.mxu0 %v69_v4  ;;  %202 = vmatpush.msra.mxu2 %v103_v11  ;;  %v102_v13 = vld [vmem:[#allocation2 + $0x170] sm:$0xff]  ;;  %v119_v14 = vld [vmem:[#allocation2 + $0x1f8] sm:$0xff]  ;;  %v65_v17 = vld [vmem:[#allocation2 + $0x48] sm:$0xff] }
   0xc   :  { %184 = vmatpush.msra.mxu1 %v85_v5  ;;  %v118_v16 = vld [vmem:[#allocation2 + $0x1f0] sm:$0xff]  ;;  %v81_v18 = vld [vmem:[#allocation2 + $0xc8] sm:$0xff]  ;;  %222 = vmatpush.msra.mxu3 %v119_v14  ;;  %v100_v19 = vld [vmem:[#allocation2 + $0x160] sm:$0xff] }
   0xd   :  { %165 = vmatpush.msra.mxu0 %v68_v6  ;;  %203 = vmatpush.msra.mxu2 %v102_v13  ;;  %v117_v20 = vld [vmem:[#allocation2 + $0x1e8] sm:$0xff]  ;;  %v64_v21 = vld [vmem:[#allocation2 + $0x40] sm:$0xff]  ;;  %v99_v23 = vld [vmem:[#allocation2 + $0x158] sm:$0xff] }
   0xe   :  { %185 = vmatpush.msra.mxu1 %v84_v7  ;;  %v80_v22 = vld [vmem:[#allocation2 + $0xc0] sm:$0xff]  ;;  %223 = vmatpush.msra.mxu3 %v118_v16  ;;  %v63_v25 = vld [vmem:[#allocation2 + $0x38] sm:$0xff]  ;;  %v98_v27 = vld [vmem:[#allocation2 + $0x150] sm:$0xff] }
   0xf   :  { %166 = vmatpush.msra.mxu0 %v67_v8  ;;  %204 = vmatpush.msra.mxu2 %v101_v15  ;;  %v116_v24 = vld [vmem:[#allocation2 + $0x1e0] sm:$0xff]  ;;  %v79_v26 = vld [vmem:[#allocation2 + $0xb8] sm:$0xff]  ;;  %v62_v29 = vld [vmem:[#allocation2 + $0x30] sm:$0xff] }
  0x10   :  { %186 = vmatpush.msra.mxu1 %v83_v9  ;;  %224 = vmatpush.msra.mxu3 %v117_v20  ;;  %v115_v28 = vld [vmem:[#allocation2 + $0x1d8] sm:$0xff]  ;;  %v78_v30 = vld [vmem:[#allocation2 + $0xb0] sm:$0xff]  ;;  %v97_v31 = vld [vmem:[#allocation2 + $0x148] sm:$0xff] }
  0x11   :  { %167 = vmatpush.msra.mxu0 %v66_v10  ;;  %205 = vmatpush.msra.mxu2 %v100_v19  ;;  %v114_v32 = vld [vmem:[#allocation2 + $0x1d0] sm:$0xff]  ;;  %v61_v33 = vld [vmem:[#allocation2 + $0x28] sm:$0xff]  ;;  %v96_v35 = vld [vmem:[#allocation2 + $0x140] sm:$0xff] }
  0x12   :  { %187 = vmatpush.msra.mxu1 %v82_v12  ;;  %225 = vmatpush.msra.mxu3 %v116_v24  ;;  %v77_v34 = vld [vmem:[#allocation2 + $0xa8] sm:$0xff]  ;;  %v60_v37 = vld [vmem:[#allocation2 + $0x20] sm:$0xff]  ;;  %v95_v39 = vld [vmem:[#allocation2 + $0x138] sm:$0xff] }
  0x13   :  { %168 = vmatpush.msra.mxu0 %v65_v17  ;;  %206 = vmatpush.msra.mxu2 %v99_v23  ;;  %v113_v36 = vld [vmem:[#allocation2 + $0x1c8] sm:$0xff]  ;;  %v76_v38 = vld [vmem:[#allocation2 + $0xa0] sm:$0xff]  ;;  %v59_v41 = vld [vmem:[#allocation2 + $0x18] sm:$0xff] }
  0x14   :  { %188 = vmatpush.msra.mxu1 %v81_v18  ;;  %226 = vmatpush.msra.mxu3 %v115_v28  ;;  %v112_v40 = vld [vmem:[#allocation2 + $0x1c0] sm:$0xff]  ;;  %v75_v42 = vld [vmem:[#allocation2 + $0x98] sm:$0xff]  ;;  %v94_v43 = vld [vmem:[#allocation2 + $0x130] sm:$0xff] }
  0x15   :  { %169 = vmatpush.msra.mxu0 %v64_v21  ;;  %207 = vmatpush.msra.mxu2 %v98_v27  ;;  %v111_v44 = vld [vmem:[#allocation2 + $0x1b8] sm:$0xff]  ;;  %v58_v45 = vld [vmem:[#allocation2 + $0x10] sm:$0xff]  ;;  %v93_v47 = vld [vmem:[#allocation2 + $0x128] sm:$0xff] }
  0x16   :  { %189 = vmatpush.msra.mxu1 %v80_v22  ;;  %227 = vmatpush.msra.mxu3 %v114_v32  ;;  %v74_v46 = vld [vmem:[#allocation2 + $0x90] sm:$0xff]  ;;  %v57_v49 = vld [vmem:[#allocation2 + $0x8] sm:$0xff]  ;;  %v92_v51 = vld [vmem:[#allocation2 + $0x120] sm:$0xff] }
  0x17   :  { %170 = vmatpush.msra.mxu0 %v63_v25  ;;  %208 = vmatpush.msra.mxu2 %v97_v31  ;;  %v110_v48 = vld [vmem:[#allocation2 + $0x1b0] sm:$0xff]  ;;  %v73_v50 = vld [vmem:[#allocation2 + $0x88] sm:$0xff]  ;;  %v56_v53 = vld [vmem:[#allocation2] sm:$0xff] }
  0x18   :  { %190 = vmatpush.msra.mxu1 %v79_v26  ;;  %228 = vmatpush.msra.mxu3 %v113_v36  ;;  %v109_v52 = vld [vmem:[#allocation2 + $0x1a8] sm:$0xff]  ;;  %v72_v54 = vld [vmem:[#allocation2 + $0x80] sm:$0xff]  ;;  %v135_v55 = vld [vmem:[#allocation2 + $0x278] sm:$0xff] }
  0x19   :  { %171 = vmatpush.msra.mxu0 %v62_v29  ;;  %209 = vmatpush.msra.mxu2 %v96_v35  ;;  %v151_v56 = vld [vmem:[#allocation2 + $0x2f8] sm:$0xff]  ;;  %v108_v58 = vld [vmem:[#allocation2 + $0x1a0] sm:$0xff]  ;;  %v134_v59 = vld [vmem:[#allocation2 + $0x270] sm:$0xff] }
  0x1a   :  { %191 = vmatpush.msra.mxu1 %v78_v30  ;;  %229 = vmatpush.msra.mxu3 %v112_v40  ;;  %v91_v57 = vld [vmem:[#allocation2 + $0x118] sm:$0xff]  ;;  %v150_v60 = vld [vmem:[#allocation2 + $0x2f0] sm:$0xff]  ;;  %v133_v63 = vld [vmem:[#allocation2 + $0x268] sm:$0xff] }
  0x1b   :  { %172 = vmatpush.msra.mxu0 %v61_v33  ;;  %210 = vmatpush.msra.mxu2 %v95_v39  ;;  %v90_v61 = vld [vmem:[#allocation2 + $0x110] sm:$0xff]  ;;  %v107_v62 = vld [vmem:[#allocation2 + $0x198] sm:$0xff]  ;;  %v149_v0 = vld [vmem:[#allocation2 + $0x2e8] sm:$0xff] }
  0x1c   :  { %192 = vmatpush.msra.mxu1 %v77_v34  ;;  %230 = vmatpush.msra.mxu3 %v111_v44  ;;  %v89_v1 = vld [vmem:[#allocation2 + $0x108] sm:$0xff]  ;;  %v106_v2 = vld [vmem:[#allocation2 + $0x190] sm:$0xff]  ;;  %v132_v3 = vld [vmem:[#allocation2 + $0x260] sm:$0xff] }
  0x1d   :  { %173 = vmatpush.msra.mxu0 %v60_v37  ;;  %211 = vmatpush.msra.mxu2 %v94_v43  ;;  %v131_v4 = vld [vmem:[#allocation2 + $0x258] sm:$0xff]  ;;  %v148_v5 = vld [vmem:[#allocation2 + $0x2e0] sm:$0xff]  ;;  %v105_v8 = vld [vmem:[#allocation2 + $0x188] sm:$0xff] }
  0x1e   :  { %193 = vmatpush.msra.mxu1 %v76_v38  ;;  %231 = vmatpush.msra.mxu3 %v110_v48  ;;  %v147_v6 = vld [vmem:[#allocation2 + $0x2d8] sm:$0xff]  ;;  %v88_v7 = vld [vmem:[#allocation2 + $0x100] sm:$0xff]  ;;  %v51_v9 = vld [vmem:[%s685_s0 + $0x10] sm:$0xff] }
  0x1f   :  { %174 = vmatpush.msra.mxu0 %v59_v41  ;;  %212 = vmatpush.msra.mxu2 %v93_v47  ;;  %v104_v10 = vld [vmem:[#allocation2 + $0x180] sm:$0xff]  ;;  %v130_v11 = vld [vmem:[#allocation2 + $0x250] sm:$0xff]  ;;  %v153_v13 = vld [vmem:[#allocation2 + $0x308] sm:$0xff] }
  0x20   :  { %194 = vmatpush.msra.mxu1 %v75_v42  ;;  %232 = vmatpush.msra.mxu3 %v109_v52  ;;  %v146_v12 = vld [vmem:[#allocation2 + $0x2d0] sm:$0xff]  ;;  %v49_v14 = vld [vmem:[%s685_s0] sm:$0xff]  ;;  %v129_v15 = vld [vmem:[#allocation2 + $0x248] sm:$0xff] }
  0x21   :  { %175 = vmatpush.msra.mxu0 %v58_v45  ;;  %213 = vmatpush.msra.mxu2 %v92_v51  ;;  %v145_v16 = vld [vmem:[#allocation2 + $0x2c8] sm:$0xff]  ;;  %v52_v17 = vld [vmem:[%s685_s0 + $0x18] sm:$0xff]  ;;  %v128_v19 = vld [vmem:[#allocation2 + $0x240] sm:$0xff] }
  0x22   :  { %195 = vmatpush.msra.mxu1 %v74_v46  ;;  %233 = vmatpush.msra.mxu3 %v108_v58  ;;  %v50_v18 = vld [vmem:[%s685_s0 + $0x8] sm:$0xff]  ;;  %v144_v20 = vld [vmem:[#allocation2 + $0x2c0] sm:$0xff]  ;;  %v318_v22 = vld [vmem:[%s688_s3 + $0x78] sm:$0xff] }
  0x23   :  { %176 = vmatpush.msra.mxu0 %v57_v49  ;;  %214 = vmatpush.msra.mxu2 %v91_v57  ;;  %v152_v21 = vld [vmem:[#allocation2 + $0x300] sm:$0xff]  ;;  %v127_v23 = vld [vmem:[#allocation2 + $0x238] sm:$0xff]  ;;  %v55_v25 = vld [vmem:[%s685_s0 + $0x30] sm:$0xff] }
  0x24   :  { %196 = vmatpush.msra.mxu1 %v73_v50  ;;  %234 = vmatpush.msra.mxu3 %v107_v62  ;;  %v143_v24 = vld [vmem:[#allocation2 + $0x2b8] sm:$0xff]  ;;  %v317_v26 = vld [vmem:[%s688_s3 + $0x70] sm:$0xff]  ;;  %v316_v29 = vld [vmem:[%s688_s3 + $0x68] sm:$0xff] }
  0x25   :  { %177 = vmatpush.msra.mxu0 %v56_v53  ;;  %215 = vmatpush.msra.mxu2 %v90_v61  ;;  %v126_v27 = vld [vmem:[#allocation2 + $0x230] sm:$0xff]  ;;  %v125_v30 = vld [vmem:[#allocation2 + $0x228] sm:$0xff]  ;;  %v315_v32 = vld [vmem:[%s688_s3 + $0x60] sm:$0xff] }
  0x26   :  { %197 = vmatpush.msra.mxu1 %v72_v54  ;;  %235 = vmatpush.msra.mxu3 %v106_v2  ;;  %v142_v28 = vld [vmem:[#allocation2 + $0x2b0] sm:$0xff]  ;;  %v141_v31 = vld [vmem:[#allocation2 + $0x2a8] sm:$0xff]  ;;  %v124_v33 = vld [vmem:[#allocation2 + $0x220] sm:$0xff] }
  0x27   :  { %242 = vmatpush.msrb.mxu0 %v135_v55  ;;  %216 = vmatpush.msra.mxu2 %v89_v1  ;;  %v140_v34 = vld [vmem:[#allocation2 + $0x2a0] sm:$0xff]  ;;  %v314_v35 = vld [vmem:[%s688_s3 + $0x58] sm:$0xff]  ;;  %v313_v38 = vld [vmem:[%s688_s3 + $0x50] sm:$0xff] }
  0x28   :  { %262 = vmatpush.msrb.mxu1 %v151_v56  ;;  %236 = vmatpush.msra.mxu3 %v105_v8  ;;  %v123_v36 = vld [vmem:[#allocation2 + $0x218] sm:$0xff]  ;;  %v122_v39 = vld [vmem:[#allocation2 + $0x210] sm:$0xff]  ;;  %v312_v41 = vld [vmem:[%s688_s3 + $0x48] sm:$0xff] }
  0x29   :  { %243 = vmatpush.msrb.mxu0 %v134_v59  ;;  %217 = vmatpush.msra.mxu2 %v88_v7  ;;  %v139_v37 = vld [vmem:[#allocation2 + $0x298] sm:$0xff]  ;;  %v138_v40 = vld [vmem:[#allocation2 + $0x290] sm:$0xff]  ;;  %v121_v42 = vld [vmem:[#allocation2 + $0x208] sm:$0xff] }
  0x2a   :  { %263 = vmatpush.msrb.mxu1 %v150_v60  ;;  %218 = vmatmul.f32.vlgmr.msra.gmra.mxu2 %v51_v9  ;;  %v137_v43 = vld [vmem:[#allocation2 + $0x288] sm:$0xff]  ;;  %v120_v44 = vld [vmem:[#allocation2 + $0x200] sm:$0xff]  ;;  %v310_v49 = vld [vmem:[%s688_s3 + $0x38] sm:$0xff] }
  0x2b   :  { %244 = vmatpush.msrb.mxu0 %v133_v63  ;;  %237 = vmatpush.msra.mxu3 %v104_v10  ;;  %v136_v45 = vld [vmem:[#allocation2 + $0x280] sm:$0xff]  ;;  %v54_v47 = vld [vmem:[%s685_s0 + $0x28] sm:$0xff]  ;;  %v309_v50 = vld [vmem:[%s688_s3 + $0x30] sm:$0xff] }
  0x2c   :  { %264 = vmatpush.msrb.mxu1 %v149_v0  ;;  %296 = vmatpush.msrb.mxu2 %v153_v13  ;;  %v53_v46 = vld [vmem:[%s685_s0 + $0x20] sm:$0xff]  ;;  %v308_v51 = vld [vmem:[%s688_s3 + $0x28] sm:$0xff]  ;;  %v306_v53 = vld [vmem:[%s688_s3 + $0x18] sm:$0xff] }
  0x2d   :  { %245 = vmatpush.msrb.mxu0 %v132_v3  ;;  %238 = vmatmul.f32.vlgmr.msra.gmra.mxu3 %v52_v17  ;;  %v311_v48 = vld [vmem:[%s688_s3 + $0x40] sm:$0xff]  ;;  %v305_v54 = vld [vmem:[%s688_s3 + $0x10] sm:$0xff]  ;;  %v304_v55 = vld [vmem:[%s688_s3 + $0x8] sm:$0xff] }
  0x2e   :  { %265 = vmatpush.msrb.mxu1 %v148_v5  ;;  %178 = vmatmul.f32.vlgmr.msra.gmra.mxu0 %v49_v14  ;;  %v307_v52 = vld [vmem:[%s688_s3 + $0x20] sm:$0xff]  ;;  %v351_v57 = vld [vmem:[%s690_s5 + $0x38] sm:$0xff]  ;;  %v350_v58 = vld [vmem:[%s690_s5 + $0x30] sm:$0xff] }
  0x2f   :  { %246 = vmatpush.msrb.mxu0 %v131_v4  ;;  %198 = vmatmul.f32.vlgmr.msra.gmra.mxu1 %v50_v18  ;;  %v303_v56 = vld [vmem:[%s688_s3] sm:$0xff]  ;;  %v349_v59 = vld [vmem:[%s690_s5 + $0x28] sm:$0xff]  ;;  %v347_v63 = vld [vmem:[%s690_s5 + $0x18] sm:$0xff] }
  0x30   :  { %266 = vmatpush.msrb.mxu1 %v147_v6  ;;  %297 = vmatpush.msrb.mxu2 %v152_v21  ;;  %v448_v60 = vld [vmem:[%s687_s2] ss:$0 sm:$0xff]  ;;  %v346_v14 = vld [vmem:[%s690_s5 + $0x10] sm:$0xff]  ;;  %v384_v17 = vld [vmem:[%s692_s7 + $0x18] sm:$0xff] }
  0x31   :  { %247 = vmatpush.msrb.mxu0 %v130_v11  ;;  %323 = vmatpush.msrb.mxu3 %v318_v22  ;;  %v348_v61 = vld [vmem:[%s690_s5 + $0x20] sm:$0xff]  ;;  %v383_v18 = vld [vmem:[%s692_s7 + $0x10] sm:$0xff] }
  0x32   :  { %267 = vmatpush.msrb.mxu1 %v146_v12  ;;  %441 = vmatmul.msk.f32.vlgmr.msrb.gmra.mxu2 %vm158_vm0, %v55_v25  ;;  %v450_v25 = vld [vmem:[%s691_s6] ss:$0 sm:$0xff]  ;;  %s511_s6 = smov [#allocation5]  }
  0x33   :  { %248 = vmatpush.msrb.mxu0 %v129_v15  ;;  %324 = vmatpush.msrb.mxu3 %v317_v26  ;;  %v345_v15 = vld [vmem:[%s690_s5 + $0x8] sm:$0xff] }
  0x34   :  { %268 = vmatpush.msrb.mxu1 %v145_v16  ;;  %368 = vmatpush.msra.mxu2 %v351_v57  ;;  %v344_v16 = vld [vmem:[%s690_s5] sm:$0xff] }
  0x35   :  { %249 = vmatpush.msrb.mxu0 %v128_v19  ;;  %325 = vmatpush.msrb.mxu3 %v316_v29  ;;  %v449_v19 = vld [vmem:[%s689_s4] ss:$0 sm:$0xff] }
  0x36   :  { %269 = vmatpush.msrb.mxu1 %v144_v20  ;;  %369 = vmatpush.msra.mxu2 %v350_v58  ;;  %v451_v29 = vld [vmem:[%s693_s8] ss:$0 sm:$0xff] }
  0x37   :  { %250 = vmatpush.msrb.mxu0 %v127_v23  ;;  %326 = vmatpush.msrb.mxu3 %v315_v32  ;;  %v382_v23 = vld [vmem:[%s692_s7 + $0x8] sm:$0xff] }
  0x38   :  { %270 = vmatpush.msrb.mxu1 %v143_v24  ;;  %370 = vmatpush.msra.mxu2 %v349_v59  ;;  %v381_v24 = vld [vmem:[%s692_s7] sm:$0xff]  ;;  %s429_s7 = sshll.u32 %s511_s6, 4  ;;  %s430_s7 = int_to_ptr.vmem [resolvable:$true] %s429_s7 }
  0x39   :  { %251 = vmatpush.msrb.mxu0 %v126_v27  ;;  %327 = vmatpush.msrb.mxu3 %v314_v35 }
  0x3a   :  { %271 = vmatpush.msrb.mxu1 %v142_v28  ;;  %371 = vmatpush.msra.mxu2 %v348_v61 }
  0x3b   :  { %252 = vmatpush.msrb.mxu0 %v125_v30  ;;  %328 = vmatpush.msrb.mxu3 %v313_v38 }
  0x3c   :  { %272 = vmatpush.msrb.mxu1 %v141_v31  ;;  %372 = vmatpush.msra.mxu2 %v347_v63 }
  0x3d   :  { %253 = vmatpush.msrb.mxu0 %v124_v33  ;;  %329 = vmatpush.msrb.mxu3 %v312_v41 }
  0x3e   :  { %273 = vmatpush.msrb.mxu1 %v140_v34  ;;  %373 = vmatpush.msra.mxu2 %v346_v14 }
  0x3f   :  { %254 = vmatpush.msrb.mxu0 %v123_v36  ;;  %330 = vmatpush.msrb.mxu3 %v311_v48 }
  0x40   :  { %274 = vmatpush.msrb.mxu1 %v139_v37  ;;  %374 = vmatpush.msra.mxu2 %v345_v15 }
  0x41   :  { %255 = vmatpush.msrb.mxu0 %v122_v39  ;;  %331 = vmatpush.msrb.mxu3 %v310_v49 }
  0x42   :  { %275 = vmatpush.msrb.mxu1 %v138_v40  ;;  %375 = vmatpush.msra.mxu2 %v344_v16 }
  0x43   :  { %256 = vmatpush.msrb.mxu0 %v121_v42  ;;  %332 = vmatpush.msrb.mxu3 %v309_v50 }
  0x44   :  { %276 = vmatpush.msrb.mxu1 %v137_v43  ;;  %405 = vmatpush.msrb.mxu2 %v384_v17 }
  0x45   :  { %257 = vmatpush.msrb.mxu0 %v120_v44  ;;  %333 = vmatpush.msrb.mxu3 %v308_v51 }
  0x46   :  { %277 = vmatpush.msrb.mxu1 %v136_v45  ;;  %258 = vmatmul.f32.vlgmr.msrb.gmra.mxu0 %v53_v46 }
  0x47   :  { %278 = vmatmul.f32.vlgmr.msrb.gmra.mxu1 %v54_v47  ;;  %334 = vmatpush.msrb.mxu3 %v307_v52 }
  0x48   :  { %406 = vmatpush.msrb.mxu2 %v383_v18 }
  0x49   :  { %335 = vmatpush.msrb.mxu3 %v306_v53 }
  0x4a   :  { %407 = vmatpush.msrb.mxu2 %v382_v23 }
  0x4b   :  { %336 = vmatpush.msrb.mxu3 %v305_v54 }
  0x4c   :  { %408 = vmatpush.msrb.mxu2 %v381_v24 }
  0x4d   :  { %337 = vmatpush.msrb.mxu3 %v304_v55 }
  0x4f   :  { %338 = vmatpush.msrb.mxu3 %v303_v56 }
  0xab   :  { %v179_v62 = vpop.f32.mrf.mxu0 }
  0xac   :  { %v180_v0 = vadd.f32 %v448_v60, %v179_v62  ;;  %v199_v1 = vpop.f32.mrf.mxu1 }
  0xad   :  { %v219_v3 = vpop.f32.mrf.mxu2 }
  0xae   :  { %v200_v2 = vadd.f32 %v199_v1, %v180_v0 }
  0xb0   :  { %v220_v4 = vadd.f32 %v219_v3, %v200_v2  ;;  %v239_v5 = vpop.f32.mrf.mxu3 }
  0xb2   :  { %v240_v6 = vadd.f32 %v239_v5, %v220_v4 }
  0xb5   :  { %v299_v10 = vpop.f32.mrf.mxu2 }
  0xc3   :  { %v259_v7 = vpop.f32.mrf.mxu0 }
  0xc4   :  { %v279_v8 = vpop.f32.mrf.mxu1  ;;  %v260_v9 = vadd.f32 %v259_v7, %v240_v6 }
  0xc6   :  { %v280_v11 = vadd.f32 %v279_v8, %v260_v9 }
  0xc8   :  { %v300_v12 = vadd.f32 %v299_v10, %v280_v11 }
  0xca   :  { %v302_v13 = vmax.f32 %v300_v12, 0.0 }
  0xcc   :  { %339 = vmatmul.f32.vlgmr.msrb.gmra.mxu3 %v302_v13 }
 0x14f   :  { %v340_v20 = vpop.f32.mrf.mxu3 }
 0x150   :  { %v341_v21 = vadd.f32 %v449_v19, %v340_v20 }
 0x152   :  { %v343_v22 = vmax.f32 %v341_v21, 0.0 }
 0x154   :  { %442 = vmatmul.msk.f32.vlgmr.msra.gmra.mxu2 %vm356_vm1, %v343_v22 }
 0x1d7   :  { %v377_v26 = vpop.f32.mrf.mxu2 }
 0x1d8   :  { %v378_v27 = vadd.f32 %v450_v25, %v377_v26 }
 0x1da   :  { %v380_v28 = vmax.f32 %v378_v27, 0.0 }
 0x1dc   :  { %443 = vmatmul.msk.f32.vlgmr.msrb.gmra.mxu2 %vm389_vm2, %v380_v28 }
 0x25f   :  { %v410_v30 = vpop.f32.mrf.mxu2 }
 0x260   :  { %v411_v31 = vadd.f32 %v451_v29, %v410_v30 }
 0x262   :  { %413 = vmax.xlane.f32.xlu0 %v411_v31 }
 0x2d5   :  { %v414_v32 = vpop.xlane.xlu0 %413 }
 0x2d6   :  { %v415_v33 = vsub.f32 %v411_v31, %v414_v32 }
 0x2d8   :  { %v416_v34 = vmul.f32 1.442695, %v415_v33 }
 0x2da   :  { %452 = vpow2.f32 %v416_v34 }
 0x2e0   :  { %v453_v35 = vpop.eup %452 }
 0x2e1   :  { %418 = vadd.xlane.f32.xlu0 %v453_v35 }
 0x354   :  { %v419_v36 = vpop.xlane.xlu0 %418 }
 0x355   :  { %454 = vlog2.f32 %v419_v36 }
 0x35b   :  { %v455_v37 = vpop.eup %454 }
 0x35c   :  { %v421_v38 = vmul.f32 0.6931472, %v455_v37 }
 0x35e   :  { %v422_v39 = vsub.f32 %v415_v33, %v421_v38 }
 0x360   :  { %423 = vst [vmem:[#allocation5] sm:$0xff] %v422_v39 }
 0x361   :  { %434 = dma.vmem_to_hbm [thread:$0]  %s430_s7, 128, %s432_s23, [#allocation4]  }
 0x362   :  { %506 = dma.done.wait [#allocation4], 128  }
 0x363   :  { %507 = vsyncadd [#allocation4], 4294967168 }
 0x364   :  { %439 = vsyncpa [#allocation3], 1 }
 0x365   :  { %440 = vsyncpa [#allocation4], 1 }

</bundles_post_ra>
